<compile_context>
chip_gen: v7x
topology: tpu7x:2x2x1
jax: 0.10.0
libtpu: 0.0.40
codegen_flags: <defaults>
</compile_context>

<pallas_src>
import functools

import jax
import jax.numpy as jnp
from jax import lax
from jax.experimental import pallas as pl
from jax.experimental.pallas import tpu as pltpu

_LANE = 128
_MAX_TN = 4096  # lane width beyond which DMA efficiency has long saturated


def _channel_sim_kernel(f_src_ref, f_tgt_ref, out_ref, g_src_ref, g_tgt_ref,
                        *, n_total, tn):
    k = pl.program_id(1)

    # Zero the per-batch Gram accumulators at the start of each batch element.
    @pl.when(k == 0)
    def _():
        g_src_ref[...] = jnp.zeros_like(g_src_ref)
        g_tgt_ref[...] = jnp.zeros_like(g_tgt_ref)

    f_src = f_src_ref[...]  # (C, TN), native dtype (e.g. bf16 or f32)
    f_tgt = f_tgt_ref[...]  # (C, TN)

    if n_total % tn != 0:
        # Ragged last spatial tile: the out-of-bounds lanes of the block are
        # unspecified, so zero them before they enter the Gram contraction.
        # (Replaces the old wrapper-side jnp.pad HBM copy.)
        valid = jnp.int32(n_total) - k * jnp.int32(tn)
        lane = lax.broadcasted_iota(jnp.int32, f_src.shape, 1)
        keep = lane < valid
        f_src = jnp.where(keep, f_src, jnp.zeros_like(f_src))
        f_tgt = jnp.where(keep, f_tgt, jnp.zeros_like(f_tgt))

    # Partial channel Gram: contract over this spatial tile, accumulate in f32 VMEM.
    dn = (((1,), (1,)), ((), ()))
    g_src_ref[...] += lax.dot_general(f_src, f_src, dn,
                                      preferred_element_type=jnp.float32)
    g_tgt_ref[...] += lax.dot_general(f_tgt, f_tgt, dn,
                                      preferred_element_type=jnp.float32)

    # Finalize on the last spatial tile: normalize, diff, Frobenius-norm reduce.
    @pl.when(k == pl.num_programs(1) - 1)
    def _():
        a_src = g_src_ref[...]
        a_tgt = g_tgt_ref[...]
        # F.normalize(A, p=2, dim=1) with clamp_min(1e-12):
        # rsqrt(max(sum(A^2, rows), eps^2)) == 1 / max(||col||, eps), on the EUP.
        eps_sq = jnp.float32(1e-24)
        inv_src = lax.rsqrt(jnp.maximum(
            jnp.sum(a_src * a_src, axis=0, keepdims=True), eps_sq))
        inv_tgt = lax.rsqrt(jnp.maximum(
            jnp.sum(a_tgt * a_tgt, axis=0, keepdims=True), eps_sq))
        diff = a_src * inv_src - a_tgt * inv_tgt
        per_batch = jnp.sum(diff * diff) / jnp.float32(a_src.shape[0])
        # Lane-dense (8, 128) store; the wrapper reads [:, 0, 0].
        out_ref[...] = jnp.full(out_ref.shape, per_batch, dtype=out_ref.dtype)


def _vmem_caps():
    """(physical VMEM bytes, per-kernel budget) for the current TPU generation."""
    try:
        cap = int(pltpu.get_tpu_info().vmem_capacity_bytes)
    except Exception:
        cap = 64 * 1024 * 1024  # conservative fallback (v7x per-TC size)
    # ~60% of physical VMEM for this kernel: v5e/v6e (128 MiB) -> ~77 MiB of tile
    # space (2048-4096 lane tiles), v7x (64 MiB) -> ~38 MiB (stays well under the
    # ceiling while still reaching its 3.2 TB/s roofline with ~1024-lane tiles).
    budget = min((cap * 3) // 5, 96 * 1024 * 1024)
    return cap, budget


def _choose_tiling(n, c, itemsize, max_tn=None):
    """Pick the spatial tile width TN, the grid extent along it, and an explicit
    scoped-VMEM limit, accounting for every VMEM consumer in this kernel."""
    cap_phys, budget = _vmem_caps()
    # Fixed VMEM consumers the tile budget must leave room for.
    reserve = (2 * c * c * 4            # two f32 (C, C) Gram accumulators
               + 2 * 8 * _LANE * 4      # double-buffered (8, 128) f32 output block
               + (2 << 20))             # Mosaic internal scratch head-room
    tile_budget = max(budget - reserve, 4 * c * _LANE * itemsize)
    # 2 inputs x 2 pipeline buffers of a (C, TN) tile.
    cap = tile_budget // (4 * c * itemsize)
    cap = max(_LANE, (cap // _LANE) * _LANE)
    if max_tn is not None:
        cap = min(cap, max(_LANE, (max_tn // _LANE) * _LANE))
    if n <= cap:
        tn = n                          # single full-extent tile (no masking needed)
    else:
        tn = min(cap, _MAX_TN)          # lane-aligned tile; ragged tail masked in-kernel
    kt = (n + tn - 1) // tn
    # Explicit scoped-VMEM limit sized to the actual footprint (+ margin) so large
    # tiles compile past the per-generation default scoped limits, clamped below
    # physical VMEM for the v7x 64 MiB parts.
    used = 4 * c * tn * itemsize + reserve
    vmem_limit = int(min(max(used + (4 << 20), 32 << 20), cap_phys - (4 << 20)))
    return tn, kt, vmem_limit


def channel_sim_loss(featmap_src_T, featmap_tgt_S, *, max_tn=None):
    B, C = featmap_src_T.shape[:2]
    # Keep native dtype (bf16 in / f32-accumulate on the MXU); no wrapper-side cast.
    # TODO(synk): for f32 inputs in the compute-bound regime (very large C) a bf16
    # cast before the dots would halve HBM bytes; kept f32 to preserve tolerances.
    f_src = featmap_src_T.reshape(B, C, -1)
    f_tgt = featmap_tgt_S.reshape(B, C, -1)
    N = f_src.shape[-1]

    itemsize = jnp.dtype(f_src.dtype).itemsize
    tn, kt, vmem_limit = _choose_tiling(N, C, itemsize, max_tn=max_tn)

    kernel = functools.partial(_channel_sim_kernel, n_total=N, tn=tn)

    out = pl.pallas_call(
        kernel,
        out_shape=jax.ShapeDtypeStruct((B, 8, _LANE), jnp.float32),
        grid_spec=pltpu.PrefetchScalarGridSpec(
            num_scalar_prefetch=0,
            grid=(B, kt),
            in_specs=[
                pl.BlockSpec((pl.Squeezed(), C, tn), lambda b, k: (b, 0, k)),
                pl.BlockSpec((pl.Squeezed(), C, tn), lambda b, k: (b, 0, k)),
            ],
            out_specs=pl.BlockSpec((pl.Squeezed(), 8, _LANE), lambda b, k: (b, 0, 0)),
            scratch_shapes=[
                pltpu.VMEM((C, C), jnp.float32),  # Gram accumulator (src)
                pltpu.VMEM((C, C), jnp.float32),  # Gram accumulator (tgt)
            ],
        ),
        compiler_params=pltpu.CompilerParams(
            # Batch axis is independent (shards across TensorCores on v7x);
            # spatial-tile axis is a reduction into the VMEM accumulators.
            dimension_semantics=("parallel", "arbitrary"),
            vmem_limit_bytes=vmem_limit,
        ),
    )(f_src, f_tgt)

    # Per-batch losses live at [:, 0, 0]; batch mean matches torch.mean(... / C).
    return jnp.mean(out[:, 0, 0])


def _reference_loss(featmap_src_T, featmap_tgt_S):
    # Pure-JAX reference mirroring the PyTorch module (f32 accumulation like the kernel).
    B, C = featmap_src_T.shape[:2]
    f_src = featmap_src_T.reshape(B, C, -1)
    f_tgt = featmap_tgt_S.reshape(B, C, -1)
    a_src = jnp.einsum("bcn,bdn->bcd", f_src, f_src,
                       preferred_element_type=jnp.float32)
    a_tgt = jnp.einsum("bcn,bdn->bcd", f_tgt, f_tgt,
                       preferred_element_type=jnp.float32)
    eps = 1e-12
    a_src = a_src / jnp.maximum(
        jnp.sqrt(jnp.sum(a_src * a_src, axis=1, keepdims=True)), eps)
    a_tgt = a_tgt / jnp.maximum(
        jnp.sqrt(jnp.sum(a_tgt * a_tgt, axis=1, keepdims=True)), eps)
    diff = a_src - a_tgt
    return jnp.mean(jnp.sum(diff * diff, axis=(1, 2)) / C)


if __name__ == "__main__":
    key = jax.random.PRNGKey(0)
    k1, k2, k3, k4, k5, k6 = jax.random.split(key, 6)

    # Primary test case: f32 inputs, aligned spatial extent (N = 256, single tile).
    B, C, H, W = 2, 4, 16, 16
    featmap_src = jax.random.normal(k1, (B, C, H, W), dtype=jnp.float32)
    featmap_tgt = jax.random.normal(k2, (B, C, H, W), dtype=jnp.float32)

    ref = jax.block_until_ready(_reference_loss(featmap_src, featmap_tgt))

    loss = jax.block_until_ready(channel_sim_loss(featmap_src, featmap_tgt))
    assert jnp.allclose(loss, ref, rtol=1e-4, atol=1e-5), (loss, ref)

    # Force the multi-tile accumulation path (TN = 128 -> 2 evenly dividing tiles).
    loss_tiled = jax.block_until_ready(
        channel_sim_loss(featmap_src, featmap_tgt, max_tn=128))
    assert jnp.allclose(loss_tiled, ref, rtol=1e-4, atol=1e-5), (loss_tiled, ref)

    # Unaligned spatial extent, single full-extent tile (N = 49, no pad, no mask).
    src_u = jax.random.normal(k3, (2, 4, 7, 7), dtype=jnp.float32)
    tgt_u = jax.random.normal(k4, (2, 4, 7, 7), dtype=jnp.float32)
    ref_u = jax.block_until_ready(_reference_loss(src_u, tgt_u))
    loss_u = jax.block_until_ready(channel_sim_loss(src_u, tgt_u))
    assert jnp.allclose(loss_u, ref_u, rtol=1e-4, atol=1e-5), (loss_u, ref_u)

    # Ragged multi-tile path: N = 400, TN = 128 -> 4 tiles, last tile masked in-kernel.
    src_r = jax.random.normal(k5, (2, 4, 20, 20), dtype=jnp.float32)
    tgt_r = jax.random.normal(k6, (2, 4, 20, 20), dtype=jnp.float32)
    ref_r = jax.block_until_ready(_reference_loss(src_r, tgt_r))
    loss_r = jax.block_until_ready(channel_sim_loss(src_r, tgt_r, max_tn=128))
    assert jnp.allclose(loss_r, ref_r, rtol=1e-4, atol=1e-5), (loss_r, ref_r)

    # bf16 inputs go straight to the MXU (f32 accumulation); loose tolerance vs bf16 ref.
    src_bf = featmap_src.astype(jnp.bfloat16)
    tgt_bf = featmap_tgt.astype(jnp.bfloat16)
    ref_bf = jax.block_until_ready(_reference_loss(src_bf, tgt_bf))
    loss_bf = jax.block_until_ready(channel_sim_loss(src_bf, tgt_bf))
    assert jnp.allclose(loss_bf, ref_bf, rtol=5e-2, atol=1e-3), (loss_bf, ref_bf)

    print("KERNEL_OK")
</pallas_src>

<mosaic_0001>
module attributes {stable_mosaic.version = 11 : i64} {
  func.func @_channel_sim_kernel(%arg0: i32, %arg1: i32, %arg2: memref<1x4x256xf32, #tpu.memory_space<vmem>>, %arg3: memref<1x4x256xf32, #tpu.memory_space<vmem>>, %arg4: memref<1x8x128xf32, #tpu.memory_space<vmem>>, %arg5: memref<4x4xf32, #tpu.memory_space<vmem>>, %arg6: memref<4x4xf32, #tpu.memory_space<vmem>>) attributes {dimension_semantics = [#tpu.dimension_semantics<parallel>, #tpu.dimension_semantics<arbitrary>], iteration_bounds = array<i64: 2, 1>, scalar_prefetch = 0 : i64, scratch_operands = 2 : i64, tpu.core_type = #tpu.core_type<tc>, window_params = [{transform_indices = @transform_0, window_bounds = array<i64: 1, 4, 256>}, {transform_indices = @transform_1, window_bounds = array<i64: 1, 4, 256>}, {transform_indices = @transform_2, window_bounds = array<i64: 1, 8, 128>}]} {
    %c0_i32 = arith.constant 0 : i32
    %0 = arith.cmpi eq, %arg1, %c0_i32 : i32
    %1 = arith.extui %0 : i1 to i32
    %c0_i32_0 = arith.constant 0 : i32
    %2 = arith.cmpi ne, %1, %c0_i32_0 : i32
    scf.if %2 {
      %cst_17 = arith.constant 0.000000e+00 : f32
      %18 = vector.broadcast %cst_17 : f32 to vector<4x4xf32>
      %c0_18 = arith.constant 0 : index
      %c0_19 = arith.constant 0 : index
      %19 = vector.load %arg5[%c0_18, %c0_19] : memref<4x4xf32, #tpu.memory_space<vmem>>, vector<4x4xf32>
      tpu.vector_store %arg5[%c0_18, %c0_19], %18 {strides = array<i32>} : memref<4x4xf32, #tpu.memory_space<vmem>>, vector<4x4xf32>,
      %cst_20 = arith.constant 0.000000e+00 : f32
      %20 = vector.broadcast %cst_20 : f32 to vector<4x4xf32>
      %c0_21 = arith.constant 0 : index
      %c0_22 = arith.constant 0 : index
      %21 = vector.load %arg6[%c0_21, %c0_22] : memref<4x4xf32, #tpu.memory_space<vmem>>, vector<4x4xf32>
      tpu.vector_store %arg6[%c0_21, %c0_22], %20 {strides = array<i32>} : memref<4x4xf32, #tpu.memory_space<vmem>>, vector<4x4xf32>,
    } else {
    }
    %c0 = arith.constant 0 : index
    %c0_1 = arith.constant 0 : index
    %c0_2 = arith.constant 0 : index
    %3 = vector.load %arg2[%c0, %c0_1, %c0_2] : memref<1x4x256xf32, #tpu.memory_space<vmem>>, vector<1x4x256xf32>
    %4 = vector.shape_cast %3 : vector<1x4x256xf32> to vector<4x256xf32>
    %c0_3 = arith.constant 0 : index
    %c0_4 = arith.constant 0 : index
    %c0_5 = arith.constant 0 : index
    %5 = vector.load %arg3[%c0_3, %c0_4, %c0_5] : memref<1x4x256xf32, #tpu.memory_space<vmem>>, vector<1x4x256xf32>
    %6 = vector.shape_cast %5 : vector<1x4x256xf32> to vector<4x256xf32>
    %c0_6 = arith.constant 0 : index
    %c0_7 = arith.constant 0 : index
    %7 = vector.load %arg5[%c0_6, %c0_7] : memref<4x4xf32, #tpu.memory_space<vmem>>, vector<4x4xf32>
    %cst = arith.constant dense<0.000000e+00> : vector<4x4xf32>
    %8 = tpu.matmul %4, %4, %cst {dimension_numbers = #tpu.dot_dimension_numbers<[1], [1], [0], [0], [0, 0, 1, 0], [], []>} : vector<4x256xf32>, vector<4x256xf32>, vector<4x4xf32> -> vector<4x4xf32>
    %9 = arith.addf %7, %8 : vector<4x4xf32>
    %c0_8 = arith.constant 0 : index
    %c0_9 = arith.constant 0 : index
    %10 = vector.load %arg5[%c0_8, %c0_9] : memref<4x4xf32, #tpu.memory_space<vmem>>, vector<4x4xf32>
    tpu.vector_store %arg5[%c0_8, %c0_9], %9 {strides = array<i32>} : memref<4x4xf32, #tpu.memory_space<vmem>>, vector<4x4xf32>,
    %c0_10 = arith.constant 0 : index
    %c0_11 = arith.constant 0 : index
    %11 = vector.load %arg6[%c0_10, %c0_11] : memref<4x4xf32, #tpu.memory_space<vmem>>, vector<4x4xf32>
    %cst_12 = arith.constant dense<0.000000e+00> : vector<4x4xf32>
    %12 = tpu.matmul %6, %6, %cst_12 {dimension_numbers = #tpu.dot_dimension_numbers<[1], [1], [0], [0], [0, 0, 1, 0], [], []>} : vector<4x256xf32>, vector<4x256xf32>, vector<4x4xf32> -> vector<4x4xf32>
    %13 = arith.addf %11, %12 : vector<4x4xf32>
    %c0_13 = arith.constant 0 : index
    %c0_14 = arith.constant 0 : index
    %14 = vector.load %arg6[%c0_13, %c0_14] : memref<4x4xf32, #tpu.memory_space<vmem>>, vector<4x4xf32>
    tpu.vector_store %arg6[%c0_13, %c0_14], %13 {strides = array<i32>} : memref<4x4xf32, #tpu.memory_space<vmem>>, vector<4x4xf32>,
    %c0_i32_15 = arith.constant 0 : i32
    %15 = arith.cmpi eq, %arg1, %c0_i32_15 : i32
    %16 = arith.extui %15 : i1 to i32
    %c0_i32_16 = arith.constant 0 : i32
    %17 = arith.cmpi ne, %16, %c0_i32_16 : i32
    scf.if %17 {
      %c0_17 = arith.constant 0 : index
      %c0_18 = arith.constant 0 : index
      %18 = vector.load %arg5[%c0_17, %c0_18] : memref<4x4xf32, #tpu.memory_space<vmem>>, vector<4x4xf32>
      %c0_19 = arith.constant 0 : index
      %c0_20 = arith.constant 0 : index
      %19 = vector.load %arg6[%c0_19, %c0_20] : memref<4x4xf32, #tpu.memory_space<vmem>>, vector<4x4xf32>
      %20 = arith.mulf %18, %18 : vector<4x4xf32>
      %cst_21 = arith.constant dense<0.000000e+00> : vector<4xf32>
      %21 = vector.multi_reduction <add>, %20, %cst_21 [0] : vector<4x4xf32> to vector<4xf32>
      %22 = vector.shape_cast %21 : vector<4xf32> to vector<1x4xf32>
      %cst_22 = arith.constant 1.000000e-24 : f32
      %23 = vector.broadcast %cst_22 : f32 to vector<1x4xf32>
      %24 = arith.maximumf %22, %23 : vector<1x4xf32>
      %25 = math.rsqrt %24 : vector<1x4xf32>
      %26 = arith.mulf %19, %19 : vector<4x4xf32>
      %cst_23 = arith.constant dense<0.000000e+00> : vector<4xf32>
      %27 = vector.multi_reduction <add>, %26, %cst_23 [0] : vector<4x4xf32> to vector<4xf32>
      %28 = vector.shape_cast %27 : vector<4xf32> to vector<1x4xf32>
      %cst_24 = arith.constant 1.000000e-24 : f32
      %29 = vector.broadcast %cst_24 : f32 to vector<1x4xf32>
      %30 = arith.maximumf %28, %29 : vector<1x4xf32>
      %31 = math.rsqrt %30 : vector<1x4xf32>
      %32 = vector.broadcast %25 : vector<1x4xf32> to vector<4x4xf32>
      %33 = arith.mulf %18, %32 : vector<4x4xf32>
      %34 = vector.broadcast %31 : vector<1x4xf32> to vector<4x4xf32>
      %35 = arith.mulf %19, %34 : vector<4x4xf32>
      %36 = arith.subf %33, %35 : vector<4x4xf32>
      %37 = arith.mulf %36, %36 : vector<4x4xf32>
      %38 = vector.shape_cast %37 : vector<4x4xf32> to vector<1x4x4xf32>
      %cst_25 = arith.constant dense<0.000000e+00> : vector<1xf32>
      %39 = vector.multi_reduction <add>, %38, %cst_25 [1, 2] : vector<1x4x4xf32> to vector<1xf32>
      %40 = vector.shape_cast %39 : vector<1xf32> to vector<1x1x1xf32>
      %41 = vector.extract %40[0, 0, 0] : f32 from vector<1x1x1xf32>
      %cst_26 = arith.constant 4.000000e+00 : f32
      %42 = arith.divf %41, %cst_26 : f32
      %43 = vector.broadcast %42 : f32 to vector<8x128xf32>
      %c0_27 = arith.constant 0 : index
      %c0_28 = arith.constant 0 : index
      %c0_29 = arith.constant 0 : index
      %44 = vector.load %arg4[%c0_27, %c0_28, %c0_29] : memref<1x8x128xf32, #tpu.memory_space<vmem>>, vector<1x8x128xf32>
      %45 = vector.shape_cast %44 : vector<1x8x128xf32> to vector<8x128xf32>
      %46 = vector.shape_cast %43 : vector<8x128xf32> to vector<1x8x128xf32>
      tpu.vector_store %arg4[%c0_27, %c0_28, %c0_29], %46 {strides = array<i32>} : memref<1x8x128xf32, #tpu.memory_space<vmem>>, vector<1x8x128xf32>,
    } else {
    }
    return
  }
  func.func @transform_0(%arg0: i32, %arg1: i32) -> (i32, i32, i32) {
    %c0_i32 = arith.constant 0 : i32
    %c0_i32_0 = arith.constant 0 : i32
    return %arg0, %c0_i32, %arg1 : i32, i32, i32
  }
  func.func @transform_1(%arg0: i32, %arg1: i32) -> (i32, i32, i32) {
    %c0_i32 = arith.constant 0 : i32
    %c0_i32_0 = arith.constant 0 : i32
    return %arg0, %c0_i32, %arg1 : i32, i32, i32
  }
  func.func @transform_2(%arg0: i32, %arg1: i32) -> (i32, i32, i32) {
    %c0_i32 = arith.constant 0 : i32
    %c0_i32_0 = arith.constant 0 : i32
    %c0_i32_1 = arith.constant 0 : i32
    return %arg0, %c0_i32, %c0_i32_0 : i32, i32, i32
  }
}

</mosaic_0001>

<bundles_post_ra>
// kernel: tpu_custom_call.1
= control target key start
LH: loop header
LB: loop body
LE: loop exit
PB: predicated region body
PF: predicated region fallthrough
CT: control target
= control target key end

     0   :  { %7 = vsyncpa [#allocation5], 0  ;;  %s1042_s0 = inlined_call_operand.hbm [shape: f32[2,4,256], index: 0, kind: input, shape index: {}]   ;;  %s1043_s1 = inlined_call_operand.hbm [shape: f32[2,4,256], index: 1, kind: input, shape index: {}]   ;;  %s1044_s2 = inlined_call_operand.hbm [shape: f32[2,8,128], index: 2, kind: output, shape index: {}]  }
   0x1   :  { %9 = vsyncpa [#allocation5 + $0x1], 0 }
   0x2   :  { %10 = vsyncpa [#allocation8], 0 }
   0x3   :  { %12 = vsyncpa [#allocation8 + $0x1], 0 }
   0x4   :  { %13 = vsyncpa [#allocation6], 0 }
   0x5   :  { %15 = vsyncpa [#allocation6 + $0x1], 0  ;;  %s810_s9 = smov 0   ;;  %s812_s10 = smov 0  }
   0x6   :  { %s814_s11 = smov 0   ;;  %s816_s12 = smov 0  }
   0x7   :  { %s818_s13 = smov 0   ;;  %s820_s14 = smov 0  }
   0x8 LB: > { %s547_s15 = sadd.s32 4294967295, %s789_s14   ;;  %s548_s16 = sadd.s32 4294967294, %s789_s14   ;;  %s789_s14 = sphi %s820_s14, %s21_s14   ;;  %s785_s13 = sphi %s818_s13, %s1064_s13   ;;  %s781_s12 = sphi %s816_s12, %s1063_s12   ;;  %s777_s11 = sphi %s814_s11, %s1062_s11   ;;  %s773_s10 = sphi %s812_s10, %s1061_s10   ;;  %s769_s9 = sphi %s810_s9, %s1060_s9  }
   0x9   : > { %s33_s17 = sadd.s32 1, %s785_s13  ;;  %s42_s18 = sadd.s32 1, %s777_s11 }
   0xa   : > { %p35_p0 = scmp.ge.s32.totalorder %s33_s17, 2  ;;  %p49_p1 = scmp.ne.s32.totalorder %s777_s11, %s773_s10 }
   0xb   : > { %p50_p2 = scmp.eq.s32.totalorder %s789_s14, 0  ;;  %p55_p3 = scmp.ne.s32.totalorder %s773_s10, %s769_s9 }
   0xc   : > { %s1066_s17 = smov (%p35_p0, %s33_s17), 0  ;;  %p56_p5 = scmp.eq.s32.totalorder %s547_s15, 0 }
   0xd   : > { %p851_p4 = por %p50_p2, %p49_p1  ;;  %s37_s20 = ssub.s32 %s785_s13, %s1066_s17 }
   0xe   : > { %p107_p6 = scmp.eq.s32.totalorder %s547_s15, 1  ;;  %p40_p7 = scmp.eq.s32.totalorder %s37_s20, 0 }
   0xf   : > { %p857_p8 = por %p56_p5, %p55_p3  ;;  %p113_p10 = scmp.eq.s32.totalorder %s548_s16, 1 }
  0x10   : > { %p861_p9 = por %p107_p6, %p49_p1  ;;  %p586_p13 = scmp.lt.s32.totalorder %s789_s14, 2 }
  0x11   : > { %s1048_s21 = scalar_select %p857_p8, 1, 0 }
  0x12   : > { %s1049_s22 = scalar_select %p861_p9, 1, 0 }
  0x13   : > { %s866_s23 = scalar_select %p40_p7, %s777_s11, %s42_s18  }
  0x14   : > { %p868_p11 = por %p113_p10, %p55_p3  ;;  %s875_s25 = sand.u32 1, %s777_s11  }
  0x15   : > { %s551_s26 = sshll.u32 %s875_s25, 3  ;;  %s565_s27 = sshll.u32 %s785_s13, 7 }
  0x16   : > { %s1050_s24 = scalar_select %p868_p11, 1, 0 }
  0x17   : > { %s884_s30 = scalar_lea.hbm %s1042_s0, %s565_s27  ;;  %s137_s3 = scalar_lea.vmem [#allocation4], %s551_s26 }
  0x18   : > { %s147_s4 = sshll.u32 %s137_s3, 4  ;;  %p892_p0 = pnand %p586_p13, %p851_p4  ;;  %s888_s4 = int_to_ptr.vmem [resolvable:$true] %s147_s4 }
  0x19   : > { %s134_s6 = scalar_lea.sflag [#allocation5], %s875_s25  ;;  %s643_s7 = scalar_lea.hbm %s884_s30, 128 }
  0x1a   : > { %p644_p3 = scmp.ne.s32.totalorder %s884_s30, %s643_s7  ;;  %p645_p5 = pneg %p892_p0 }
  0x1b   : > { %s648_s16 = scalar_lea.hbm %s1042_s0, 256  ;;  %p649_p4 = scmp.lt.u32.totalorder %s884_s30, %s1042_s0 }
  0x1c   : > { %p646_p6 = pnand %p645_p5, %p644_p3  ;;  %p650_p10 = scmp.lt.u32.totalorder %s648_s16, %s643_s7 }
  0x1d   : > { %p652_p12 = scmp.lt.u32.totalorder %s643_s7, %s884_s30 }
  0x1e   : > { %p647_p7 = pneg %p646_p6  ;;  %p651_p13 = por %p650_p10, %p649_p4 }
  0x20   : > { %p653_p1 = por %p652_p12, %p651_p13 }
  0x22   : > { %p654_p2 = pnand %p653_p1, %p647_p7 }
  0x24   : > { %657 = shalt.err (!%p654_p2)
}
  0x25   : > { %s658_s20 = scalar_lea.vmem %s888_s4, 128  ;;  %s791_s28 = smov [#allocation4]  }
  0x26   : > { %p659_p3 = scmp.ne.s32.totalorder %s888_s4, %s658_s20  ;;  %s663_s29 = sshll.u32 %s791_s28, 4  ;;  %s664_s29 = int_to_ptr.vmem [resolvable:$false] %s663_s29 }
  0x27   : > { %s665_s3 = scalar_lea.vmem %s664_s29, 256  ;;  %p666_p9 = scmp.lt.s32.totalorder %s888_s4, %s664_s29 }
  0x28   : > { %p661_p6 = pnand %p659_p3, %p645_p5  ;;  %p667_p4 = scmp.lt.s32.totalorder %s665_s3, %s658_s20 }
  0x2a   : > { %p662_p11 = pneg %p661_p6  ;;  %p668_p10 = por %p667_p4, %p666_p9 }
  0x2c   : > { %p669_p12 = pnand %p668_p10, %p662_p11 }
  0x2e   : > { %672 = shalt.err (!%p669_p12)
}
  0x2f   : > { %578 = dma.hbm_to_vmem [thread:$0]  (!%p892_p0), %s884_s30, 128, %s888_s4, %s134_s6  }
  0x30   : > { %p1052_p1 = scmp.lt.s32.totalorder %s789_s14, 3  ;;  %p1053_p2 = scmp.ge.s32.totalorder %s789_s14, 1 }
  0x31   : > { %s937_s16 = scalar_lea.hbm %s1043_s1, %s565_s27  ;;  %s158_s18 = scalar_lea.vmem [#allocation7], %s551_s26 }
  0x32   : > { %p928_p7 = pnand %p1053_p2, %p1052_p1  ;;  %s168_s19 = sshll.u32 %s158_s18, 4  ;;  %s169_s19 = int_to_ptr.vmem [resolvable:$true] %s168_s19 }
  0x33   : > { %s155_s30 = scalar_lea.sflag [#allocation8], %s875_s25  ;;  %s673_s4 = scalar_lea.hbm %s937_s16, 128 }
  0x34   : > { %s1054_s7 = scalar_select %p928_p7, 1, 0 }
  0x35   : > { %p674_p9 = scmp.ne.s32.totalorder %s937_s16, %s673_s4  ;;  %s678_s27 = scalar_lea.hbm %s1043_s1, 256 }
  0x36   : > { %p679_p3 = scmp.lt.u32.totalorder %s937_s16, %s1043_s1  ;;  %p680_p6 = scmp.lt.u32.totalorder %s678_s27, %s673_s4 }
  0x37   : > { %p676_p11 = pnand %p674_p9, %p645_p5  ;;  %p682_p10 = scmp.lt.u32.totalorder %s673_s4, %s937_s16 }
  0x38   : > { %p681_p4 = por %p680_p6, %p679_p3 }
  0x39   : > { %p677_p13 = pneg %p676_p11 }
  0x3a   : > { %p683_p12 = por %p682_p10, %p681_p4 }
  0x3c   : > { %p684_p1 = pnand %p683_p12, %p677_p13 }
  0x3e   : > { %687 = shalt.err (!%p684_p1)
}
  0x3f   : > { %s688_s25 = scalar_lea.vmem %s169_s19, 128  ;;  %s792_s26 = smov [#allocation7]  }
  0x40   : > { %p689_p2 = scmp.ne.s32.totalorder %s169_s19, %s688_s25  ;;  %s693_s3 = sshll.u32 %s792_s26, 4  ;;  %s694_s3 = int_to_ptr.vmem [resolvable:$false] %s693_s3 }
  0x41   : > { %s695_s8 = scalar_lea.vmem %s694_s3, 256  ;;  %p696_p8 = scmp.lt.s32.totalorder %s169_s19, %s694_s3 }
  0x42   : > { %p691_p9 = pnand %p689_p2, %p645_p5  ;;  %p697_p7 = scmp.lt.s32.totalorder %s695_s8, %s688_s25 }
  0x44   : > { %p692_p11 = pneg %p691_p9  ;;  %p698_p3 = por %p697_p7, %p696_p8 }
  0x46   : > { %p699_p6 = pnand %p698_p3, %p692_p11 }
  0x48   : > { %702 = shalt.err (!%p699_p6)
}
  0x49   : > { %581 = dma.hbm_to_vmem [thread:$0]  (!%p892_p0), %s937_s16, 128, %s169_s19, %s155_s30  }
  0x4a   : > { %p1055_p13 = scmp.ne.s32.totalorder %s1054_s7, 0 }
  0x4b   : > { %s964_s15 = sand.u32 (!%p1055_p13), 1, %s773_s10   ;;  %p1056_p8 = scmp.ne.s32.totalorder (!%p1055_p13), %s1048_s21, 0 }
  0x4c   : > { %177 = sbr.rel (%p1055_p13) target bundleno = 572 (0x23c), region = 28  ;;  %s967_s18 = sshll.u32 (!%p1055_p13), %s964_s15, 3 }
  0x4d   : > { %s180_s4 = scalar_lea.sflag (!%p1055_p13), [#allocation5], %s964_s15  ;;  %s183_s6 = scalar_lea.vmem (!%p1055_p13), [#allocation4], %s967_s18 }
  0x53   : > { %756 = dma.done.wait (%p1056_p8), %s180_s4, 128  }
  0x54   : > { %758 = vsyncadd (%p1056_p8), %s180_s4, 4294967168  ;;  %s189_s5 = scalar_lea.sflag [#allocation8], %s964_s15  ;;  %s192_s7 = scalar_lea.vmem [#allocation7], %s967_s18 }
  0x55   : > { %760 = dma.done.wait (%p1056_p8), %s189_s5, 128  }
  0x56   : > { %762 = vsyncadd (%p1056_p8), %s189_s5, 4294967168  ;;  %vm224_vm0 = vcmask 27648   ;;  %v793_v0 = vmov 0.0   ;;  %v227_v1 = vld [vmem:[%s183_s6] sm:$0xff]  ;;  %v228_v2 = vld [vmem:[%s192_s7] sm:$0xff]  ;;  %s217_s21 = scalar_lea.vmem [#allocation9], %s967_s18 }
  0x57   : > { %225 = vst.msk [vmem:[#allocation2] sm:$0xf] %vm224_vm0, %v793_v0  ;;  %226 = vst.msk [vmem:[#allocation3] sm:$0xf] %vm224_vm0, %v793_v0  ;;  %v231_v3 = vcombine.high %v227_v1, %v227_v1  ;;  %v308_v4 = vcombine.high %v228_v2, %v228_v2  ;;  %s440_s16 = sshll.u32 %s217_s21, 4  ;;  %s562_s19 = sshll.u32 %s781_s12, 7  ;;  %s995_s16 = int_to_ptr.vmem [resolvable:$true] %s440_s16 }
  0x58   : > { %s993_s29 = scalar_lea.hbm %s1044_s2, %s562_s19  ;;  %s427_s25 = scalar_lea.sflag [#allocation6], %s964_s15 }
  0x59   : > { %233 = vmatprep.subr.mxu0 %v231_v3  ;;  %310 = vmatprep.subr.mxu1 %v308_v4  ;;  %s703_s26 = scalar_lea.vmem %s995_s16, 128  ;;  %p1057_p5 = scmp.ne.s32.totalorder %s1049_s22, 0 }
  0x5a   : > { %234 = vmatpush1.xpose.msra.mxu0 %v227_v1  ;;  %311 = vmatpush1.xpose.msra.mxu1 %v228_v2  ;;  %p704_p0 = scmp.ne.s32.totalorder %s995_s16, %s703_s26  ;;  %s794_s12 = smov [#allocation9]  }
  0x5b   : > { %297 = vmatprep.mubr.f32.mxu0 %v231_v3  ;;  %374 = vmatprep.mubr.f32.mxu1 %v308_v4  ;;  %s707_s3 = sshll.u32 %s794_s12, 4  ;;  %s708_s3 = int_to_ptr.vmem [resolvable:$false] %s707_s3 }
  0x5c   : > { %p705_p7 = pnand %p704_p0, %p1057_p5  ;;  %s709_s8 = scalar_lea.vmem %s708_s3, 256 }
  0x5d   : > { %298 = vmatmul.mubr.f32.vlgmr.msra.gmra.mrb[0].mxu0 %v227_v1  ;;  %375 = vmatmul.mubr.f32.vlgmr.msra.gmra.mrb[0].mxu1 %v228_v2  ;;  %p710_p10 = scmp.lt.s32.totalorder %s995_s16, %s708_s3  ;;  %p711_p12 = scmp.lt.s32.totalorder %s709_s8, %s703_s26 }
  0x5e   : > { %v229_v5 = vld [vmem:[#allocation2] sm:$0xf]  ;;  %v306_v6 = vld [vmem:[#allocation3] sm:$0xf]  ;;  %p706_p4 = pneg %p705_p7 }
  0x5f   : > { %p712_p1 = por %p711_p12, %p710_p10 }
  0x61   : > { %p713_p2 = pnand %p712_p1, %p706_p4 }
 0x130   : > { %v299_v7 = vpop.f32.mrb[0].mxu0  ;;  %v376_v8 = vpop.f32.mrb[0].mxu1 }
 0x131   : > { %v303_v9 = vadd.f32 %v299_v7, %v229_v5  ;;  %v380_v10 = vadd.f32 %v376_v8, %v306_v6  ;;  %v301_v11 = vpop.f32.mrb[1].mxu0  ;;  %v378_v12 = vpop.f32.mrb[1].mxu1 }
 0x133   : > { %305 = vst.msk [vmem:[#allocation2] sm:$0xf] %vm224_vm0, %v303_v9  ;;  %381 = vst.msk [vmem:[#allocation3] sm:$0xf] %vm224_vm0, %v380_v10 }
 0x13a   : > { %v385_v13 = vld [vmem:[#allocation2] sm:$0xf]  ;;  %v386_v14 = vld [vmem:[#allocation3] sm:$0xf] }
 0x13b   : > { %v387_v15 = vmul.f32 %v385_v13, %v385_v13  ;;  %v397_v16 = vmul.f32 %v386_v14, %v386_v14 }
 0x13d   : > { %v388_v17 = vsel %vm224_vm0, %v387_v15, 0.0  ;;  %v398_v18 = vsel %vm224_vm0, %v397_v16, 0.0 }
 0x13e   : > { %v389_v19 = vrot.slane %v388_v17, 4  ;;  %v399_v20 = vrot.slane %v398_v18, 4 }
 0x140   : > { %v390_v21 = vadd.f32 %v389_v19, %v388_v17  ;;  %v400_v22 = vadd.f32 %v399_v20, %v398_v18 }
 0x142   : > { %v391_v23 = vrot.slane %v390_v21, 2  ;;  %v401_v24 = vrot.slane %v400_v22, 2 }
 0x144   : > { %v392_v25 = vadd.f32 %v391_v23, %v390_v21  ;;  %v402_v26 = vadd.f32 %v401_v24, %v400_v22 }
 0x146   : > { %v393_v27 = vrot.slane %v392_v25, 1  ;;  %v403_v28 = vrot.slane %v402_v26, 1 }
 0x148   : > { %v394_v29 = vadd.f32 %v393_v27, %v392_v25  ;;  %v404_v30 = vadd.f32 %v403_v28, %v402_v26 }
 0x14a   : > { %v395_v31 = vmax.f32 %v394_v29, 1e-24  ;;  %v405_v32 = vmax.f32 %v404_v30, 1e-24 }
 0x14c   : > { %639 = vrsqrt.f32 %v395_v31 }
 0x14d   : > { %641 = vrsqrt.f32 %v405_v32 }
 0x156   : > { %v640_v33 = vpop.eup %639 }
 0x157   : > { %v642_v34 = vpop.eup %641  ;;  %v407_v35 = vmul.f32 %v640_v33, %v385_v13 }
 0x158   : > { %v408_v36 = vmul.f32 %v642_v34, %v386_v14 }
 0x15a   : > { %v409_v37 = vsub.f32 %v407_v35, %v408_v36 }
 0x15c   : > { %v410_v38 = vmul.f32 %v409_v37, %v409_v37 }
 0x15e   : > { %v411_v39 = vsel %vm224_vm0, %v410_v38, 0.0 }
 0x15f   : > { %412 = vadd.xlane.f32.xlu0 %v411_v39 }
 0x1ec   : > { %v413_v40 = vpop.xlane.xlu0 %412 }
 0x1ed   : > { %v414_v41 = vrot.slane %v413_v40, 4 }
 0x1ef   : > { %v415_v42 = vadd.f32 %v414_v41, %v413_v40 }
 0x1f1   : > { %v416_v43 = vrot.slane %v415_v42, 2 }
 0x1f3   : > { %v417_v44 = vadd.f32 %v416_v43, %v415_v42 }
 0x1f5   : > { %v418_v45 = vrot.slane %v417_v44, 1 }
 0x1f7   : > { %v419_v46 = vadd.f32 %v418_v45, %v417_v44 }
 0x1f9   : > { %567 = vpush %v419_v46 }
 0x22a   : > { %s568_s30 = spop %567 }
 0x22b   : > { %s423_s20 = smul.f32 0.25, %s568_s30 }
 0x22d   : > { %v424_v47 = vstv %s423_s20 }
 0x22e   : > { %425 = vst [vmem:[%s217_s21] sm:$0xff] %v424_v47 }
 0x22f   : > { %716 = shalt.err (!%p713_p2)
}
 0x230   : > { %s717_s15 = scalar_lea.hbm %s993_s29, 128  ;;  %s721_s6 = scalar_lea.hbm %s1044_s2, 256 }
 0x231   : > { %p718_p9 = scmp.ne.s32.totalorder %s993_s29, %s717_s15  ;;  %p722_p6 = scmp.lt.u32.totalorder %s993_s29, %s1044_s2 }
 0x232   : > { %p723_p13 = scmp.lt.u32.totalorder %s721_s6, %s717_s15  ;;  %p725_p0 = scmp.lt.u32.totalorder %s717_s15, %s993_s29 }
 0x233   : > { %p719_p11 = pnand %p718_p9, %p1057_p5 }
 0x234   : > { %p724_p8 = por %p723_p13, %p722_p6 }
 0x235   : > { %p720_p3 = pneg %p719_p11 }
 0x236   : > { %p726_p7 = por %p725_p0, %p724_p8 }
 0x238   : > { %p727_p4 = pnand %p726_p7, %p720_p3 }
 0x23a   : > { %730 = shalt.err (!%p727_p4)
}
 0x23b   : > { %573 = dma.vmem_to_hbm [thread:$0]  (%p1057_p5), %s995_s16, 128, %s993_s29, %s427_s25  }
 0x23c PF: > { %s452_s21 = sand.u32 1, %s769_s9   ;;  %p1058_p10 = scmp.ne.s32.totalorder %s1050_s24, 0 }
 0x23d   : > { %p1059_p12 = scmp.ge.s32.totalorder %s789_s14, 2  ;;  %s453_s19 = scalar_lea.sflag [#allocation6], %s452_s21 }
 0x23f   : > { %p583_p1 = pnand %p1059_p12, %p1058_p10 }
 0x241   : > { %764 = dma.done.wait (!%p583_p1), %s453_s19, 128  }
 0x242   : > { %766 = vsyncadd (!%p583_p1), %s453_s19, 4294967168  ;;  %s21_s14 = sadd.s32 1, %s789_s14   ;;  %s1060_s9 = smov %s773_s10 }
 0x243   : > { %p18_p2 = scmp.ge.s32.totalorder %s21_s14, 4   ;;  %s1061_s10 = smov %s777_s11 }
 0x244   : > { %s1062_s11 = smov %s866_s23  ;;  %s1063_s12 = smov %s785_s13 }
 0x245   : > { %s1064_s13 = smov %s1066_s17  ;;  %20 = sbr.rel (!%p18_p2) target bundleno = 8 (0x8), region = 94 }
 0x24c   :  { %458 = vsyncpa [#allocation5], 1 }
 0x24d   :  { %460 = vsyncpa [#allocation5 + $0x1], 1 }
 0x24e   :  { %461 = vsyncpa [#allocation8], 1 }
 0x24f   :  { %463 = vsyncpa [#allocation8 + $0x1], 1 }
 0x250   :  { %464 = vsyncpa [#allocation6], 1 }
 0x251   :  { %466 = vsyncpa [#allocation6 + $0x1], 1 }

</bundles_post_ra>
